<compile_context>
chip_gen: v7x
topology: tpu7x:2x2x1
jax: 0.10.0
libtpu: 0.0.40
codegen_flags: <defaults>
</compile_context>

<pallas_src>
import functools

import jax
import jax.numpy as jnp
from jax import lax
from jax.experimental import pallas as pl
from jax.experimental.pallas import tpu as pltpu


# ----------------------------------- kernel ---------------------------------------

def _patch_merging_kernel(xm_ref, w_ref, g_ref, b_ref, out_ref, *, eps):
    # xm_ref: (tile_t, 4C) bf16; w_ref: (4C, 2C) bf16; g_ref/b_ref: (1, 2C) f32.
    # Single MXU matmul with f32 accumulation.
    y = jnp.dot(xm_ref[...], w_ref[...], preferred_element_type=jnp.float32)

    # LayerNorm(2C) in f32 (biased variance, eps=1e-5); rsqrt lands on the EUP slot.
    mu = jnp.mean(y, axis=-1, keepdims=True)
    d = y - mu
    var = jnp.mean(d * d, axis=-1, keepdims=True)
    y = d * lax.rsqrt(var + eps) * g_ref[...] + b_ref[...]

    out_ref[...] = y.astype(out_ref.dtype)


# ----------------------------------- wrapper ---------------------------------------

def _pick_token_tile(t, target=512):
    """Largest multiple-of-8 divisor of t that is <= target, preferring >= 2 grid steps
    (megacore / pipelining). Falls back to the full extent when t is not 8-aligned."""
    if t % 8 != 0:
        return t                      # full-extent block is always layout-legal
    cap = min(target, t // 2) if t >= 16 else t
    cap = max(cap, 8)
    best, d = 8, 8
    while d <= cap:
        if t % d == 0:
            best = d
        d += 8
    return best


def patch_merging(x, H, W, params, *, eps=1e-5, compute_dtype=jnp.bfloat16,
                  token_tile=None):
    """PatchMerging forward. x: (B, H*W, C). Returns (y, H//2, W//2)."""
    B, L, C = x.shape
    assert L == H * W, "input feature has wrong size"
    assert H % 2 == 0 and W % 2 == 0, f"x size ({H}*{W}) are not even."
    S = (H // 2) * (W // 2)
    T = B * S
    C4, C2 = 4 * C, 2 * C

    # --- patch gather, matching torch.cat([x0, x1, x2, x3], -1) ordering -------------
    # x(B, H, W, C) -> (B, H/2, rp, W/2, wp, C) -> (B, H/2, W/2, wp, rp, C) -> (T, 4C)
    # (wp, rp) order over the 4C axis gives exactly [x0, x1, x2, x3].
    x6 = x.reshape(B, H // 2, 2, W // 2, 2, C)
    merged = jnp.transpose(x6, (0, 1, 3, 4, 2, 5)).reshape(T, C4)
    merged = merged.astype(compute_dtype)          # bf16 slab: halves input DMA bytes

    w = params["reduction_w"].astype(compute_dtype)         # (4C, 2C), pre-transposed
    g = params["norm_w"].reshape(1, C2).astype(jnp.float32)
    b = params["norm_b"].reshape(1, C2).astype(jnp.float32)

    if token_tile is None:
        token_tile = _pick_token_tile(T)
    assert T % token_tile == 0
    assert token_tile == T or token_tile % 8 == 0

    grid = (T // token_tile,)
    kernel = functools.partial(_patch_merging_kernel, eps=eps)

    cost = pl.CostEstimate(
        flops=2 * T * C4 * C2,
        transcendentals=0,
        bytes_accessed=(merged.size * merged.dtype.itemsize
                        + w.size * w.dtype.itemsize
                        + T * C2 * x.dtype.itemsize
                        + 2 * C2 * 4),
    )

    # NOTE: for very narrow channel counts (2*dim < 128) the stored last dim is below one
    # lane row; with dim >= 64 the output is lane-dense and stores are unmasked.
    out = pl.pallas_call(
        kernel,
        out_shape=jax.ShapeDtypeStruct((T, C2), x.dtype),
        grid_spec=pltpu.PrefetchScalarGridSpec(
            num_scalar_prefetch=0,
            grid=grid,
            in_specs=[
                pl.BlockSpec((token_tile, C4), lambda i: (i, 0)),
                pl.BlockSpec((C4, C2), lambda i: (0, 0)),   # weights stay VMEM-resident
                pl.BlockSpec((1, C2), lambda i: (0, 0)),
                pl.BlockSpec((1, C2), lambda i: (0, 0)),
            ],
            out_specs=pl.BlockSpec((token_tile, C2), lambda i: (i, 0)),
        ),
        compiler_params=pltpu.CompilerParams(
            dimension_semantics=("parallel",)),
        cost_estimate=cost,
    )(merged, w, g, b)

    return out.reshape(B, S, C2), H // 2, W // 2


# ------------------------------ pure-JAX reference ---------------------------------

def patch_merging_ref(x, H, W, params, eps=1e-5):
    """Mirrors the PyTorch forward (explicit strided slicing + concat) in f32."""
    B, L, C = x.shape
    xv = x.reshape(B, H, W, C)
    x0 = xv[:, 0::2, 0::2, :]
    x1 = xv[:, 1::2, 0::2, :]
    x2 = xv[:, 0::2, 1::2, :]
    x3 = xv[:, 1::2, 1::2, :]
    m = jnp.concatenate([x0, x1, x2, x3], axis=-1).reshape(B, -1, 4 * C)
    y = jnp.dot(m, params["reduction_w"])
    mu = jnp.mean(y, axis=-1, keepdims=True)
    var = jnp.mean((y - mu) ** 2, axis=-1, keepdims=True)
    return (y - mu) * lax.rsqrt(var + eps) * params["norm_w"] + params["norm_b"]


# ----------------------------------- demo ------------------------------------------

if __name__ == "__main__":
    # Small Swin-like config: dim=64 so the stored last dim (2*dim=128) is one full
    # lane-dense vreg row; B=2, H=W=16 -> 512 input tokens, 128 merged tokens total.
    B, H, W, dim = 2, 16, 16, 64

    key = jax.random.PRNGKey(0)
    kx, kw = jax.random.split(key)
    x = jax.random.normal(kx, (B, H * W, dim), dtype=jnp.float32)
    params = dict(
        # nn.Linear(4*dim, 2*dim, bias=False) weight, stored pre-transposed as (in, out)
        # so the kernel computes y = x @ W (== x @ W_pt.T in PyTorch).
        reduction_w=(jax.random.normal(kw, (4 * dim, 2 * dim), dtype=jnp.float32)
                     * (1.0 / jnp.sqrt(4.0 * dim))),
        norm_w=jnp.ones((2 * dim,), jnp.float32),    # PyTorch LayerNorm default init
        norm_b=jnp.zeros((2 * dim,), jnp.float32),
    )

    # token_tile=32 -> grid (4,): several steps so the BlockSpec pipeline hides DMA
    # behind the matmul and both v7x TensorCores get work.
    y, Ho, Wo = patch_merging(x, H, W, params, token_tile=32)
    y = jax.block_until_ready(y)

    assert y.shape == (B, (H // 2) * (W // 2), 2 * dim) and y.dtype == jnp.float32
    assert Ho == H // 2 and Wo == W // 2

    # Numerics check vs. the f32 torch-style reference (bf16 matmul operands, f32 acc).
    y_ref = patch_merging_ref(x, H, W, params)
    max_err = float(jnp.max(jnp.abs(y - y_ref)))
    assert max_err < 5e-2, f"max abs err too large: {max_err}"

    print("KERNEL_OK")
</pallas_src>

<mosaic_0001>
module attributes {stable_mosaic.version = 11 : i64} {
  func.func @_patch_merging_kernel(%arg0: i32, %arg1: memref<32x256xbf16, #tpu.memory_space<vmem>>, %arg2: memref<256x128xbf16, #tpu.memory_space<vmem>>, %arg3: memref<1x128xf32, #tpu.memory_space<vmem>>, %arg4: memref<1x128xf32, #tpu.memory_space<vmem>>, %arg5: memref<32x128xf32, #tpu.memory_space<vmem>>) attributes {dimension_semantics = [#tpu.dimension_semantics<parallel>], iteration_bounds = array<i64: 4>, scalar_prefetch = 0 : i64, scratch_operands = 0 : i64, tpu.core_type = #tpu.core_type<tc>, window_params = [{transform_indices = @transform_0, window_bounds = array<i64: 32, 256>}, {pipeline_mode = #tpu.pipeline_mode<synchronous>, transform_indices = @transform_1, window_bounds = array<i64: 256, 128>}, {pipeline_mode = #tpu.pipeline_mode<synchronous>, transform_indices = @transform_2, window_bounds = array<i64: 1, 128>}, {pipeline_mode = #tpu.pipeline_mode<synchronous>, transform_indices = @transform_3, window_bounds = array<i64: 1, 128>}, {transform_indices = @transform_4, window_bounds = array<i64: 32, 128>}]} {
    %c0 = arith.constant 0 : index
    %c0_0 = arith.constant 0 : index
    %0 = vector.load %arg1[%c0, %c0_0] : memref<32x256xbf16, #tpu.memory_space<vmem>>, vector<32x256xbf16>
    %c0_1 = arith.constant 0 : index
    %c0_2 = arith.constant 0 : index
    %1 = vector.load %arg2[%c0_1, %c0_2] : memref<256x128xbf16, #tpu.memory_space<vmem>>, vector<256x128xbf16>
    %cst = arith.constant dense<0.000000e+00> : vector<32x128xf32>
    %2 = tpu.matmul %0, %1, %cst {dimension_numbers = #tpu.dot_dimension_numbers<[1], [0], [0], [1], [0, 0, 1, 1], [], []>} : vector<32x256xbf16>, vector<256x128xbf16>, vector<32x128xf32> -> vector<32x128xf32>
    %cst_3 = arith.constant dense<0.000000e+00> : vector<32xf32>
    %3 = vector.multi_reduction <add>, %2, %cst_3 [1] : vector<32x128xf32> to vector<32xf32>
    %4 = vector.shape_cast %3 : vector<32xf32> to vector<32x1xf32>
    %cst_4 = arith.constant 1.280000e+02 : f32
    %5 = vector.broadcast %cst_4 : f32 to vector<32x1xf32>
    %6 = arith.divf %4, %5 : vector<32x1xf32>
    %7 = vector.broadcast %6 : vector<32x1xf32> to vector<32x128xf32>
    %8 = arith.subf %2, %7 : vector<32x128xf32>
    %9 = arith.mulf %8, %8 : vector<32x128xf32>
    %cst_5 = arith.constant dense<0.000000e+00> : vector<32xf32>
    %10 = vector.multi_reduction <add>, %9, %cst_5 [1] : vector<32x128xf32> to vector<32xf32>
    %11 = vector.shape_cast %10 : vector<32xf32> to vector<32x1xf32>
    %cst_6 = arith.constant 1.280000e+02 : f32
    %12 = vector.broadcast %cst_6 : f32 to vector<32x1xf32>
    %13 = arith.divf %11, %12 : vector<32x1xf32>
    %cst_7 = arith.constant 9.99999974E-6 : f32
    %14 = vector.broadcast %cst_7 : f32 to vector<32x1xf32>
    %15 = arith.addf %13, %14 : vector<32x1xf32>
    %16 = math.rsqrt %15 : vector<32x1xf32>
    %17 = vector.broadcast %16 : vector<32x1xf32> to vector<32x128xf32>
    %18 = arith.mulf %8, %17 : vector<32x128xf32>
    %c0_8 = arith.constant 0 : index
    %c0_9 = arith.constant 0 : index
    %19 = vector.load %arg3[%c0_8, %c0_9] : memref<1x128xf32, #tpu.memory_space<vmem>>, vector<1x128xf32>
    %20 = vector.broadcast %19 : vector<1x128xf32> to vector<32x128xf32>
    %21 = arith.mulf %18, %20 : vector<32x128xf32>
    %c0_10 = arith.constant 0 : index
    %c0_11 = arith.constant 0 : index
    %22 = vector.load %arg4[%c0_10, %c0_11] : memref<1x128xf32, #tpu.memory_space<vmem>>, vector<1x128xf32>
    %23 = vector.broadcast %22 : vector<1x128xf32> to vector<32x128xf32>
    %24 = arith.addf %21, %23 : vector<32x128xf32>
    %c0_12 = arith.constant 0 : index
    %c0_13 = arith.constant 0 : index
    %25 = vector.load %arg5[%c0_12, %c0_13] : memref<32x128xf32, #tpu.memory_space<vmem>>, vector<32x128xf32>
    tpu.vector_store %arg5[%c0_12, %c0_13], %24 {strides = array<i32>} : memref<32x128xf32, #tpu.memory_space<vmem>>, vector<32x128xf32>,
    return
  }
  func.func @transform_0(%arg0: i32) -> (i32, i32) {
    %c0_i32 = arith.constant 0 : i32
    %c0_i32_0 = arith.constant 0 : i32
    return %arg0, %c0_i32 : i32, i32
  }
  func.func @transform_1(%arg0: i32) -> (i32, i32) {
    %c0_i32 = arith.constant 0 : i32
    %c0_i32_0 = arith.constant 0 : i32
    %c0_i32_1 = arith.constant 0 : i32
    return %c0_i32, %c0_i32_0 : i32, i32
  }
  func.func @transform_2(%arg0: i32) -> (i32, i32) {
    %c0_i32 = arith.constant 0 : i32
    %c0_i32_0 = arith.constant 0 : i32
    %c0_i32_1 = arith.constant 0 : i32
    return %c0_i32, %c0_i32_0 : i32, i32
  }
  func.func @transform_3(%arg0: i32) -> (i32, i32) {
    %c0_i32 = arith.constant 0 : i32
    %c0_i32_0 = arith.constant 0 : i32
    %c0_i32_1 = arith.constant 0 : i32
    return %c0_i32, %c0_i32_0 : i32, i32
  }
  func.func @transform_4(%arg0: i32) -> (i32, i32) {
    %c0_i32 = arith.constant 0 : i32
    %c0_i32_0 = arith.constant 0 : i32
    return %arg0, %c0_i32 : i32, i32
  }
}

</mosaic_0001>

<bundles_post_ra>
// kernel: tpu_custom_call.1
= control target key start
LH: loop header
LB: loop body
LE: loop exit
PB: predicated region body
PF: predicated region fallthrough
CT: control target
= control target key end

     0   :  { %9 = vsyncpa [#allocation3], 0  ;;  %s1155_s0 = inlined_call_operand.hbm [shape: bf16[128,256], index: 0, kind: input, shape index: {}]   ;;  %s1156_s1 = inlined_call_operand.hbm [shape: bf16[256,128], index: 1, kind: input, shape index: {}]   ;;  %s1157_s2 = inlined_call_operand.vmem [shape: f32[1,128], index: 2, kind: input, shape index: {}]   ;;  %s1158_s3 = inlined_call_operand.vmem [shape: f32[1,128], index: 3, kind: input, shape index: {}]   ;;  %s1159_s4 = inlined_call_operand.hbm [shape: f32[128,128], index: 4, kind: output, shape index: {}]  }
   0x1   :  { %11 = vsyncpa [#allocation3 + $0x1], 0 }
   0x2   :  { %12 = vsyncpa [#allocation6], 0 }
   0x3   :  { %13 = vsyncpa [#allocation4], 0 }
   0x4   :  { %15 = vsyncpa [#allocation4 + $0x1], 0  ;;  %s947_s15 = smov 0   ;;  %s949_s16 = smov 0  }
   0x5   :  { %s951_s17 = smov 0   ;;  %s953_s18 = smov 0  }
   0x6 LB: > { %s968_s19 = sadd.s32 4294967295, %s911_s18   ;;  %s604_s20 = sadd.s32 4294967294, %s911_s18   ;;  %s911_s18 = sphi %s953_s18, %s1178_s18   ;;  %s907_s17 = sphi %s951_s17, %s1177_s17   ;;  %s903_s16 = sphi %s949_s16, %s1176_s16   ;;  %s899_s15 = sphi %s947_s15, %s1175_s15  }
   0x7   : > { %p41_p0 = scmp.ne.s32.totalorder %s903_s16, %s899_s15  ;;  %p1160_p1 = scmp.eq.s32.totalorder %s968_s19, 0 }
   0x8   : > { %p134_p3 = scmp.eq.s32.totalorder %s604_s20, 3  ;;  %p605_p5 = scmp.ge.s32.totalorder %s911_s18, 1 }
   0x9   : > { %p977_p4 = por %p1160_p1, %p41_p0  ;;  %p141_p7 = scmp.lt.s32.totalorder %s911_s18, 5 }
   0xa   : > { %p982_p6 = por %p134_p3, %p41_p0  ;;  %s913_s24 = smov [#allocation5]  }
   0xb   : > { %s1163_s21 = scalar_select %p977_p4, 1, 0 }
   0xc   : > { %s1164_s22 = scalar_select %p982_p6, 1, 0 }
   0xd   : > { %p987_p8 = pnand %p605_p5, %p141_p7  ;;  %s153_s25 = sshll.u32 %s913_s24, 4  ;;  %s154_s25 = int_to_ptr.vmem [resolvable:$true] %s153_s25 }
   0xe   : > { %s1000_s27 = sadd.s32 1, %s911_s18   ;;  %s28_s28 = sadd.s32 1, %s907_s17 }
   0xf   : > { %s1165_s23 = scalar_select %p987_p8, 1, 0 }
  0x10   : > { %p698_p9 = pneg %p987_p8  ;;  %s25_s29 = ssub.s32 %s911_s18, %s1000_s27 }
  0x11   : > { %s783_s6 = scalar_lea.hbm %s1156_s1, 2048 }
  0x12   : > { %p995_p10 = pnand %p698_p9, %p1160_p1  ;;  %p784_p11 = scmp.ne.s32.totalorder %s1156_s1, %s783_s6 }
  0x13   : > { %p790_p3 = scmp.lt.u32.totalorder %s783_s6, %s1156_s1 }
  0x14   : > { %p785_p12 = pneg %p995_p10 }
  0x16   : > { %p786_p13 = pnand %p785_p12, %p784_p11 }
  0x18   : > { %p787_p0 = pneg %p786_p13 }
  0x1a   : > { %p792_p5 = pnand %p790_p3, %p787_p0 }
  0x1c   : > { %795 = shalt.err (!%p792_p5)
}
  0x1d   : > { %s796_s11 = scalar_lea.vmem %s154_s25, 2048  ;;  %p804_p2 = scmp.lt.s32.totalorder %s154_s25, %s154_s25 }
  0x1e   : > { %p797_p7 = scmp.ne.s32.totalorder %s154_s25, %s796_s11  ;;  %p805_p6 = scmp.lt.s32.totalorder %s796_s11, %s796_s11 }
  0x20   : > { %p799_p9 = pnand %p797_p7, %p785_p12  ;;  %p806_p4 = por %p805_p6, %p804_p2 }
  0x22   : > { %p800_p1 = pneg %p799_p9 }
  0x24   : > { %p807_p8 = pnand %p806_p4, %p800_p1 }
  0x26   : > { %810 = shalt.err (!%p807_p8)
}
  0x27   : > { %s914_s12 = smov 64   ;;  %s915_s13 = smov 4  }
  0x28   : > { %701 = dma.hbm_to_vmem [thread:$0]  (!%p995_p10), %s1156_s1, 2048, %s154_s25, [#allocation6], %s914_s12, %s914_s12, %s915_s13  }
  0x29   : > { %p26_p11 = scmp.eq.s32.totalorder %s25_s29, 0  ;;  %p35_p2 = scmp.ne.s32.totalorder %s907_s17, %s903_s16 }
  0x2a   : > { %p36_p1 = scmp.eq.s32.totalorder %s911_s18, 0  ;;  %p711_p4 = scmp.lt.s32.totalorder %s911_s18, 4 }
  0x2b   : > { %s1026_s24 = scalar_select %p26_p11, %s907_s17, %s28_s28  }
  0x2c   : > { %p37_p6 = por %p36_p1, %p35_p2  ;;  %p1167_p8 = scmp.eq.s32.totalorder %s968_s19, 3 }
  0x2d   : > { %s173_s5 = sand.u32 1, %s907_s17   ;;  %s644_s6 = sshll.u32 %s911_s18, 9 }
  0x2e   : > { %p1030_p12 = por %p1167_p8, %p35_p2  ;;  %s608_s7 = sshll.u32 %s173_s5, 5 }
  0x2f   : > { %s1039_s9 = scalar_lea.hbm %s1155_s0, %s644_s6  ;;  %s177_s25 = scalar_lea.vmem [#allocation2], %s608_s7 }
  0x30   : > { %s185_s28 = sshll.u32 %s177_s25, 4  ;;  %p1041_p10 = pnand %p711_p4, %p37_p6  ;;  %s1045_s28 = int_to_ptr.vmem [resolvable:$true] %s185_s28 }
  0x31   : > { %s1047_s10 = scalar_lea.sflag [#allocation3], %s173_s5  ;;  %s811_s11 = scalar_lea.hbm %s1039_s9, 512 }
  0x32   : > { %p812_p13 = scmp.ne.s32.totalorder %s1039_s9, %s811_s11  ;;  %p813_p0 = pneg %p1041_p10 }
  0x33   : > { %s816_s14 = scalar_lea.hbm %s1155_s0, 2048  ;;  %p817_p7 = scmp.lt.u32.totalorder %s1039_s9, %s1155_s0 }
  0x34   : > { %p814_p3 = pnand %p813_p0, %p812_p13  ;;  %p818_p9 = scmp.lt.u32.totalorder %s816_s14, %s811_s11 }
  0x35   : > { %p820_p2 = scmp.lt.u32.totalorder %s811_s11, %s1039_s9 }
  0x36   : > { %p815_p5 = pneg %p814_p3  ;;  %p819_p11 = por %p818_p9, %p817_p7 }
  0x38   : > { %p821_p1 = por %p820_p2, %p819_p11 }
  0x3a   : > { %p822_p4 = pnand %p821_p1, %p815_p5 }
  0x3c   : > { %825 = shalt.err (!%p822_p4)
}
  0x3d   : > { %s826_s5 = scalar_lea.vmem %s1045_s28, 512  ;;  %s916_s7 = smov [#allocation2]  }
  0x3e   : > { %p827_p6 = scmp.ne.s32.totalorder %s1045_s28, %s826_s5  ;;  %s831_s26 = sshll.u32 %s916_s7, 4  ;;  %s832_s26 = int_to_ptr.vmem [resolvable:$false] %s831_s26 }
  0x3f   : > { %s833_s8 = scalar_lea.vmem %s832_s26, 1024  ;;  %p834_p3 = scmp.lt.s32.totalorder %s1045_s28, %s832_s26 }
  0x40   : > { %p829_p8 = pnand %p827_p6, %p813_p0  ;;  %p835_p7 = scmp.lt.s32.totalorder %s833_s8, %s826_s5 }
  0x42   : > { %p830_p13 = pneg %p829_p8  ;;  %p836_p9 = por %p835_p7, %p834_p3 }
  0x44   : > { %p837_p11 = pnand %p836_p9, %p830_p13 }
  0x46   : > { %840 = shalt.err (!%p837_p11)
}
  0x47   : > { %s917_s25 = smov 128   ;;  %s918_s11 = smov 8  }
  0x48   : > { %705 = dma.hbm_to_vmem [thread:$0]  (!%p1041_p10), %s1039_s9, 512, %s1045_s28, %s1047_s10, %s917_s25, %s917_s25, %s918_s11  }
  0x49   : > { %p1170_p0 = scmp.ne.s32.totalorder %s1165_s23, 0 }
  0x4a   : > { %s1078_s12 = sand.u32 (!%p1170_p0), 1, %s903_s16   ;;  %p1171_p5 = scmp.ne.s32.totalorder (!%p1170_p0), %s1163_s21, 0 }
  0x4b   : > { %197 = sbr.rel (%p1170_p0) target bundleno = 668 (0x29c), region = 36  ;;  %s613_s13 = sshll.u32 (!%p1170_p0), %s1078_s12, 5 }
  0x4c   : > { %s200_s14 = scalar_lea.sflag (!%p1170_p0), [#allocation3], %s1078_s12  ;;  %s1084_s20 = scalar_lea.vmem (!%p1170_p0), [#allocation2], %s613_s13 }
  0x52   : > { %886 = dma.done.wait (%p1171_p5), %s200_s14, 512  }
  0x53   : > { %888 = vsyncadd (%p1171_p5), %s200_s14, 4294966784  ;;  %p1172_p10 = scmp.eq.s32.totalorder %s968_s19, 0 }
  0x55   : > { %890 = dma.done.wait (%p1172_p10), [#allocation6], 2048   ;;  %p1173_p2 = pmov %p1172_p10 }
  0x56   : > { %v753_v0 = vld [vmem:[#allocation5 + $0x40] sm:$0xff]   ;;  %v755_v2 = vld [vmem:[#allocation5 + $0x48] sm:$0xff]   ;;  %v757_v4 = vld [vmem:[#allocation5 + $0x50] sm:$0xff]   ;;  %s231_s29 = scalar_lea.vmem [#allocation7], %s613_s13  ;;  %s645_s10 = sshll.u32 %s968_s19, 9 }
  0x57   : > { %892 = vsyncadd (%p1173_p2), [#allocation6], 4294965248  ;;  %v754_v1 = vld [vmem:[#allocation5] sm:$0xff]   ;;  %646 = vmatprep.subr.bf16.mxu0 %v753_v0  ;;  %674 = vmatprep.subr.bf16.mxu1 %v753_v0  ;;  %v756_v3 = vld [vmem:[#allocation5 + $0x8] sm:$0xff]   ;;  %s521_s6 = sshll.u32 %s231_s29, 4  ;;  %s1110_s26 = scalar_lea.hbm %s1159_s4, %s645_s10  ;;  %s1112_s6 = int_to_ptr.vmem [resolvable:$true] %s521_s6 }
  0x58   : > { %647 = vmatpush3.bf16.msra.mxu0 %v754_v1  ;;  %682 = vmatpush3.bf16.msra.mxu1 %v754_v1  ;;  %v758_v5 = vld [vmem:[#allocation5 + $0x10] sm:$0xff]   ;;  %v759_v6 = vld [vmem:[#allocation5 + $0x58] sm:$0xff]   ;;  %v761_v8 = vld [vmem:[#allocation5 + $0x60] sm:$0xff]   ;;  %s508_s8 = scalar_lea.sflag [#allocation4], %s1078_s12  ;;  %s841_s25 = scalar_lea.vmem %s1112_s6, 512 }
  0x59   : > { %648 = vmatprep.subr.bf16.mxu0 %v755_v2  ;;  %675 = vmatprep.subr.bf16.mxu1 %v755_v2  ;;  %v760_v7 = vld [vmem:[#allocation5 + $0x18] sm:$0xff]   ;;  %v762_v9 = vld [vmem:[#allocation5 + $0x20] sm:$0xff]   ;;  %v763_v10 = vld [vmem:[#allocation5 + $0x68] sm:$0xff]   ;;  %p842_p1 = scmp.ne.s32.totalorder %s1112_s6, %s841_s25  ;;  %s919_s19 = smov [#allocation7]  }
  0x5a   : > { %v771_v11 = vld [vmem:[%s1084_s20 + $0x4] ss:$8 sps:$4 sm:$0xff]   ;;  %v774_v12 = vld [vmem:[%s1084_s20 + $0x14] ss:$8 sps:$4 sm:$0xff]   ;;  %v769_v18 = vld [vmem:[%s1084_s20] ss:$8 sps:$4 sm:$0xff]  }
  0x5b   : > { %v764_v13 = vld [vmem:[#allocation5 + $0x28] sm:$0xff]   ;;  %v765_v14 = vld [vmem:[#allocation5 + $0x70] sm:$0xff]   ;;  %419 = vmatprep.mubr.bf16.mxu0 %v771_v11  ;;  %427 = vmatprep.mubr.bf16.mxu1 %v774_v12  ;;  %v767_v16 = vld [vmem:[#allocation5 + $0x78] sm:$0xff]   ;;  %p843_p4 = pnand %p842_p1, %p1030_p12  ;;  %s845_s11 = sshll.u32 %s919_s19, 4  ;;  %s846_s11 = int_to_ptr.vmem [resolvable:$false] %s845_s11 }
  0x5c   : > { %649 = vmatpush3.bf16.msra.mxu0 %v756_v3  ;;  %683 = vmatpush3.bf16.msra.mxu1 %v756_v3  ;;  %v766_v15 = vld [vmem:[#allocation5 + $0x30] sm:$0xff]   ;;  %v768_v17 = vld [vmem:[#allocation5 + $0x38] sm:$0xff]   ;;  %v636_v61 = vld [vmem:[%s1157_s2] ss:$0 sm:$0xff]  ;;  %s847_s13 = scalar_lea.vmem %s846_s11, 1024  ;;  %p848_p8 = scmp.lt.s32.totalorder %s1112_s6, %s846_s11 }
  0x5d   : > { %650 = vmatprep.subr.bf16.mxu0 %v757_v4  ;;  %676 = vmatprep.subr.bf16.mxu1 %v757_v4  ;;  %v772_v19 = vld [vmem:[%s1084_s20 + $0x10] ss:$8 sps:$4 sm:$0xff]   ;;  %v637_v63 = vld [vmem:[%s1158_s3] ss:$0 sm:$0xff]  ;;  %p844_p6 = pneg %p843_p4  ;;  %p849_p13 = scmp.lt.s32.totalorder %s847_s13, %s841_s25 }
  0x5f   : > { %p850_p3 = por %p849_p13, %p848_p8 }
  0x60   : > { %651 = vmatpush3.bf16.msra.mxu0 %v758_v5  ;;  %684 = vmatpush3.bf16.msra.mxu1 %v758_v5 }
  0x61   : > { %652 = vmatprep.subr.bf16.mxu0 %v759_v6  ;;  %677 = vmatprep.subr.bf16.mxu1 %v759_v6  ;;  %p851_p7 = pnand %p850_p3, %p844_p6 }
  0x64   : > { %653 = vmatpush3.bf16.msra.mxu0 %v760_v7  ;;  %685 = vmatpush3.bf16.msra.mxu1 %v760_v7 }
  0x65   : > { %654 = vmatprep.subr.bf16.mxu0 %v761_v8  ;;  %678 = vmatprep.subr.bf16.mxu1 %v761_v8 }
  0x68   : > { %655 = vmatpush3.bf16.msra.mxu0 %v762_v9  ;;  %686 = vmatpush3.bf16.msra.mxu1 %v762_v9 }
  0x69   : > { %656 = vmatprep.subr.bf16.mxu0 %v763_v10  ;;  %679 = vmatprep.subr.bf16.mxu1 %v763_v10 }
  0x6c   : > { %657 = vmatpush3.bf16.msra.mxu0 %v764_v13  ;;  %687 = vmatpush3.bf16.msra.mxu1 %v764_v13 }
  0x6d   : > { %658 = vmatprep.subr.bf16.mxu0 %v765_v14  ;;  %680 = vmatprep.subr.bf16.mxu1 %v765_v14 }
  0x70   : > { %659 = vmatpush3.bf16.msra.mxu0 %v766_v15  ;;  %688 = vmatpush3.bf16.msra.mxu1 %v766_v15 }
  0x71   : > { %660 = vmatprep.subr.bf16.mxu0 %v767_v16  ;;  %681 = vmatprep.subr.bf16.mxu1 %v767_v16 }
  0x74   : > { %661 = vmatpush3.bf16.msra.mxu0 %v768_v17  ;;  %689 = vmatpush3.bf16.msra.mxu1 %v768_v17 }
  0x77   : > { %420 = vmatmul.mubr.bf16.vlgmr.msra.gmra.mrb[0].mxu0 %v769_v18  ;;  %428 = vmatmul.mubr.bf16.vlgmr.msra.gmra.mrb[0].mxu1 %v772_v19 }
 0x14a   : > { %v662_v20 = vpop.f32.mrb[0].mxu0  ;;  %v668_v21 = vpop.f32.mrb[0].mxu1 }
 0x14b   : > { %v663_v22 = vpop.f32.mrb[1].mxu0  ;;  %v669_v23 = vpop.f32.mrb[1].mxu1 }
 0x14c   : > { %v664_v24 = vadd.f32 %v663_v22, %v662_v20  ;;  %v670_v25 = vadd.f32 %v669_v23, %v668_v21  ;;  %v665_v26 = vpop.f32.mrb[2].mxu0  ;;  %v671_v27 = vpop.f32.mrb[2].mxu1 }
 0x14d   : > { %v666_v28 = vpop.f32.mrb[3].mxu0  ;;  %v672_v29 = vpop.f32.mrb[3].mxu1 }
 0x14e   : > { %v667_v30 = vadd.f32 %v666_v28, %v665_v26  ;;  %v673_v31 = vadd.f32 %v672_v29, %v671_v27  ;;  %440 = vadd.xlane.f32.xlu1 %v670_v25  ;;  %436 = vadd.xlane.f32.xlu0 %v664_v24 }
 0x152   : > { %442 = vadd.xlane.f32.xlu1 %v673_v31  ;;  %438 = vadd.xlane.f32.xlu0 %v667_v30 }
 0x1db   : > { %v441_v32 = vpop.xlane.xlu1 %440  ;;  %v437_v33 = vpop.xlane.xlu0 %436 }
 0x1dc   : > { %v447_v34 = vmul.f32 0.0078125, %v441_v32  ;;  %v445_v35 = vmul.f32 0.0078125, %v437_v33 }
 0x1de   : > { %v449_v36 = vsub.f32 %v664_v24, %v445_v35  ;;  %v451_v39 = vsub.f32 %v670_v25, %v447_v34 }
 0x1df   : > { %v443_v37 = vpop.xlane.xlu1 %442  ;;  %v439_v38 = vpop.xlane.xlu0 %438 }
 0x1e0   : > { %v448_v40 = vmul.f32 0.0078125, %v443_v37  ;;  %v446_v41 = vmul.f32 0.0078125, %v439_v38  ;;  %v453_v42 = vmul.f32 %v449_v36, %v449_v36  ;;  %v455_v45 = vmul.f32 %v451_v39, %v451_v39 }
 0x1e2   : > { %v450_v43 = vsub.f32 %v667_v30, %v446_v41  ;;  %457 = vadd.xlane.f32.xlu0 %v453_v42  ;;  %v452_v44 = vsub.f32 %v673_v31, %v448_v40 }
 0x1e4   : > { %v454_v46 = vmul.f32 %v450_v43, %v450_v43  ;;  %v456_v47 = vmul.f32 %v452_v44, %v452_v44 }
 0x1e6   : > { %461 = vadd.xlane.f32.xlu0 %v455_v45  ;;  %459 = vadd.xlane.f32.xlu1 %v454_v46 }
 0x1ea   : > { %463 = vadd.xlane.f32.xlu1 %v456_v47 }
 0x26f   : > { %v458_v48 = vpop.xlane.xlu0 %457 }
 0x270   : > { %v465_v49 = vmul.f32 0.0078125, %v458_v48 }
 0x272   : > { %v469_v50 = vadd.f32 1e-05, %v465_v49 }
 0x273   : > { %v460_v51 = vpop.xlane.xlu1 %459  ;;  %v462_v52 = vpop.xlane.xlu0 %461 }
 0x274   : > { %775 = vrsqrt.f32 %v469_v50  ;;  %v466_v53 = vmul.f32 0.0078125, %v460_v51  ;;  %v467_v54 = vmul.f32 0.0078125, %v462_v52 }
 0x276   : > { %v470_v55 = vadd.f32 1e-05, %v466_v53  ;;  %v471_v56 = vadd.f32 1e-05, %v467_v54 }
 0x277   : > { %v464_v57 = vpop.xlane.xlu1 %463 }
 0x278   : > { %777 = vrsqrt.f32 %v470_v55  ;;  %v468_v58 = vmul.f32 0.0078125, %v464_v57 }
 0x279   : > { %779 = vrsqrt.f32 %v471_v56 }
 0x27a   : > { %v472_v59 = vadd.f32 1e-05, %v468_v58 }
 0x27c   : > { %781 = vrsqrt.f32 %v472_v59 }
 0x27e   : > { %v776_v60 = vpop.eup %775 }
 0x27f   : > { %v477_v62 = vmul.f32 %v776_v60, %v449_v36 }
 0x281   : > { %v488_v0 = vmul.f32 %v636_v61, %v477_v62 }
 0x282   : > { %v778_v1 = vpop.eup %777 }
 0x283   : > { %v780_v2 = vpop.eup %779  ;;  %v499_v3 = vadd.f32 %v637_v63, %v488_v0  ;;  %v478_v4 = vmul.f32 %v778_v1, %v450_v43 }
 0x284   : > { %v479_v5 = vmul.f32 %v780_v2, %v451_v39 }
 0x285   : > { %503 = vst [vmem:[%s231_s29] sm:$0xff] %v499_v3  ;;  %v489_v6 = vmul.f32 %v636_v61, %v478_v4 }
 0x286   : > { %v782_v7 = vpop.eup %781  ;;  %v490_v8 = vmul.f32 %v636_v61, %v479_v5 }
 0x287   : > { %v500_v9 = vadd.f32 %v637_v63, %v489_v6  ;;  %v480_v10 = vmul.f32 %v782_v7, %v452_v44 }
 0x288   : > { %v501_v11 = vadd.f32 %v637_v63, %v490_v8 }
 0x289   : > { %504 = vst [vmem:[%s231_s29 + $0x8] sm:$0xff] %v500_v9  ;;  %v491_v12 = vmul.f32 %v636_v61, %v480_v10 }
 0x28a   : > { %505 = vst [vmem:[%s231_s29 + $0x10] sm:$0xff] %v501_v11 }
 0x28b   : > { %v502_v13 = vadd.f32 %v637_v63, %v491_v12 }
 0x28d   : > { %506 = vst [vmem:[%s231_s29 + $0x18] sm:$0xff] %v502_v13 }
 0x28e   : > { %854 = shalt.err (!%p851_p7)
}
 0x28f   : > { %s855_s14 = scalar_lea.hbm %s1110_s26, 512  ;;  %s859_s23 = scalar_lea.hbm %s1159_s4, 2048 }
 0x290   : > { %p856_p9 = scmp.ne.s32.totalorder %s1110_s26, %s855_s14  ;;  %p860_p5 = scmp.lt.u32.totalorder %s1110_s26, %s1159_s4 }
 0x291   : > { %p861_p10 = scmp.lt.u32.totalorder %s859_s23, %s855_s14  ;;  %p863_p1 = scmp.lt.u32.totalorder %s855_s14, %s1110_s26 }
 0x292   : > { %p857_p11 = pnand %p856_p9, %p1030_p12 }
 0x293   : > { %p862_p2 = por %p861_p10, %p860_p5 }
 0x294   : > { %p858_p0 = pneg %p857_p11 }
 0x295   : > { %p864_p4 = por %p863_p1, %p862_p2 }
 0x297   : > { %p865_p6 = pnand %p864_p4, %p858_p0 }
 0x299   : > { %868 = shalt.err (!%p865_p6)
}
 0x29a   : > { %s920_s29 = smov 128   ;;  %s921_s10 = smov 8  }
 0x29b   : > { %696 = dma.vmem_to_hbm [thread:$0]  (%p1030_p12), %s1112_s6, 512, %s1110_s26, %s508_s8, %s920_s29, %s920_s29, %s921_s10  }
 0x29c PF: > { %p713_p8 = scmp.ge.s32.totalorder %s911_s18, 2  ;;  %s536_s5 = sand.u32 1, %s899_s15  }
 0x29d   : > { %p1174_p13 = scmp.ne.s32.totalorder %s1164_s22, 0  ;;  %s537_s7 = scalar_lea.sflag [#allocation4], %s536_s5 }
 0x29f   : > { %p707_p3 = pnand %p713_p8, %p1174_p13 }
 0x2a1   : > { %894 = dma.done.wait (!%p707_p3), %s537_s7, 512  }
 0x2a2   : > { %896 = vsyncadd (!%p707_p3), %s537_s7, 4294966784  ;;  %p18_p7 = scmp.ge.s32.totalorder %s1000_s27, 6   ;;  %s1175_s15 = smov %s903_s16 }
 0x2a3   : > { %s1176_s16 = smov %s907_s17  ;;  %s1177_s17 = smov %s1026_s24 }
 0x2a4   : > { %s1178_s18 = smov %s1000_s27  ;;  %20 = sbr.rel (!%p18_p7) target bundleno = 6 (0x6), region = 85 }
 0x2ab   :  { %542 = vsyncpa [#allocation3], 1 }
 0x2ac   :  { %544 = vsyncpa [#allocation3 + $0x1], 1 }
 0x2ad   :  { %545 = vsyncpa [#allocation6], 1 }
 0x2ae   :  { %546 = vsyncpa [#allocation4], 1 }
 0x2af   :  { %548 = vsyncpa [#allocation4 + $0x1], 1 }

</bundles_post_ra>
